<compile_context>
chip_gen: v7x
topology: tpu7x:2x2x1
jax: 0.10.0
libtpu: 0.0.40
codegen_flags: <defaults>
</compile_context>

<pallas_src>
import jax
import jax.numpy as jnp
from jax.experimental import pallas as pl
from jax.experimental.pallas import tpu as pltpu


def _lr_kernel(w_ref, x_ref, o_ref):
    # w_ref: (dim, 1) VMEM block, resident across all grid steps.
    # x_ref: (dim, TILE_N) streamed tile.  o_ref: (1, TILE_N).
    # Upcast after the VMEM load (no wrapper-side cast / HBM copy).
    x = x_ref[...].astype(jnp.float32)
    w = w_ref[...].astype(jnp.float32)
    # Rank-1 contraction: broadcast w across lanes on the VPU and reduce over
    # the sublane (dim) axis on the XLU.  Avoids a degenerate M=1 MXU matmul.
    z = jnp.sum(w * x, axis=0, keepdims=True)                # (1, TILE_N) f32
    # Exact sigmoid: exp lives on the EUP slot (co-issues with loads/VPU work).
    o_ref[...] = 1.0 / (1.0 + jnp.exp(-z))


def _choose_tile_n(dim, n, x_itemsize):
    """Pick a lane-dense (multiple-of-128) tile size along the sample axis."""

    def round_up(v, m):
        return ((v + m - 1) // m) * m

    # VMEM budget for the pipelined buffers; keeps us safely inside v7x's
    # 64 MiB per-TensorCore VMEM (v5e/v6e have 128 MiB, so it fits there too).
    vmem_budget = 40 * 1024 * 1024
    # Per output column: 2 double-buffered x tiles + 2 double-buffered f32 out
    # tiles.  The resident (dim, 1) w block is negligible.
    per_col = 2 * dim * x_itemsize + 2 * 4
    max_by_vmem = max(128, (vmem_budget // per_col) // 128 * 128)

    preferred = 32768                       # big tiles for small dim
    tile = min(preferred, max_by_vmem)
    # Keep roughly >= 8 grid steps so the "parallel" axis can shard across
    # v7x's two TensorCores (harmless elsewhere).
    tile = min(tile, max(128, round_up(pl.cdiv(n, 8), 128)))
    # Never larger than the (128-rounded) problem itself.
    tile = min(tile, round_up(n, 128))
    return tile


def lr_forward(w, x, *, tile_n=None):
    """Pallas forward pass of LR: sigmoid(w.T @ x).

    w: (dim, 1) float
    x: (dim, N) float (f32 or bf16; upcast in-kernel)
    returns: (1, N) float32
    """
    dim, n = x.shape
    assert w.shape == (dim, 1)

    if tile_n is None:
        tile_n = _choose_tile_n(dim, n, jnp.dtype(x.dtype).itemsize)

    # TODO(synk): for very large dim (where even double-buffered (dim, 128)
    # tiles exceed ~40 MiB of VMEM, i.e. dim >~ 40k at f32), add a second
    # "arbitrary" grid axis over dim with a VMEM accumulator + pl.when
    # init/finalize instead of loading the full (dim, tile_n) strip per step.

    grid = (pl.cdiv(n, tile_n),)

    return pl.pallas_call(
        _lr_kernel,
        out_shape=jax.ShapeDtypeStruct((1, n), jnp.float32),
        grid=grid,
        in_specs=[
            # w: constant block index -> stays resident in VMEM across tiles.
            pl.BlockSpec((dim, 1), lambda j: (0, 0)),
            # x: streamed tile-by-tile along N, double-buffered by Pallas.
            pl.BlockSpec((dim, tile_n), lambda j: (0, j)),
        ],
        out_specs=pl.BlockSpec((1, tile_n), lambda j: (0, j)),
        compiler_params=pltpu.CompilerParams(
            # Tiles along N are independent -> shard across TensorCores (v7x).
            dimension_semantics=("parallel",),
            # Above v5e/v6e scoped defaults (16/32 MiB) so large tiles still
            # double-buffer; below v7x's 64 MiB physical VMEM.
            vmem_limit_bytes=48 * 1024 * 1024,
        ),
    )(w, x)


if __name__ == "__main__":
    # Shapes consistent with the module: `dim` features, N samples (forward()
    # computes torch.mm(w.T, x), so x is laid out (dim, N)).
    # n is deliberately not a multiple of 128 to exercise the padding-free
    # ragged tail block.
    dim, n = 8, 300

    key = jax.random.PRNGKey(0)
    kw, kx = jax.random.split(key)

    # LR.__init__ uses zeros for w; a deterministic random init keeps the
    # output non-trivial (all-zero w would make every output exactly 0.5).
    w = jax.random.normal(kw, (dim, 1), dtype=jnp.float32)
    b = jnp.float32(0.0)  # defined in LR.__init__, unused in forward()
    x = jax.random.uniform(kx, (dim, n), dtype=jnp.float32)

    a = jax.block_until_ready(lr_forward(w, x))

    # Pure-JAX reference check (exact sigmoid in the kernel -> tight tolerance).
    a_ref = 1.0 / (1.0 + jnp.exp(-(w.T @ x)))
    assert a.shape == (1, n)
    assert jnp.allclose(a, a_ref, atol=1e-6, rtol=1e-6), float(
        jnp.max(jnp.abs(a - a_ref))
    )

    print("KERNEL_OK")
</pallas_src>

<mosaic_0001>
module attributes {stable_mosaic.version = 11 : i64} {
  func.func @_lr_kernel(%arg0: i32, %arg1: memref<8x1xf32, #tpu.memory_space<vmem>>, %arg2: memref<8x128xf32, #tpu.memory_space<vmem>>, %arg3: memref<1x128xf32, #tpu.memory_space<vmem>>) attributes {dimension_semantics = [#tpu.dimension_semantics<parallel>], iteration_bounds = array<i64: 3>, scalar_prefetch = 0 : i64, scratch_operands = 0 : i64, tpu.core_type = #tpu.core_type<tc>, window_params = [{pipeline_mode = #tpu.pipeline_mode<synchronous>, transform_indices = @transform_0, window_bounds = array<i64: 8, 1>}, {transform_indices = @transform_1, window_bounds = array<i64: 8, 128>}, {transform_indices = @transform_2, window_bounds = array<i64: 1, 128>}]} {
    %c0 = arith.constant 0 : index
    %c0_0 = arith.constant 0 : index
    %0 = vector.load %arg2[%c0, %c0_0] : memref<8x128xf32, #tpu.memory_space<vmem>>, vector<8x128xf32>
    %c0_1 = arith.constant 0 : index
    %c0_2 = arith.constant 0 : index
    %1 = vector.load %arg1[%c0_1, %c0_2] : memref<8x1xf32, #tpu.memory_space<vmem>>, vector<8x1xf32>
    %2 = vector.broadcast %1 : vector<8x1xf32> to vector<8x128xf32>
    %3 = arith.mulf %2, %0 : vector<8x128xf32>
    %cst = arith.constant dense<0.000000e+00> : vector<128xf32>
    %4 = vector.multi_reduction <add>, %3, %cst [0] : vector<8x128xf32> to vector<128xf32>
    %5 = vector.shape_cast %4 : vector<128xf32> to vector<1x128xf32>
    %cst_3 = arith.constant 0.000000e+00 : f32
    %6 = vector.broadcast %cst_3 : f32 to vector<1x128xf32>
    %7 = arith.subf %6, %5 : vector<1x128xf32>
    %8 = math.exp %7 : vector<1x128xf32>
    %cst_4 = arith.constant 1.000000e+00 : f32
    %9 = vector.broadcast %cst_4 : f32 to vector<1x128xf32>
    %10 = arith.addf %9, %8 : vector<1x128xf32>
    %cst_5 = arith.constant 1.000000e+00 : f32
    %11 = vector.broadcast %cst_5 : f32 to vector<1x128xf32>
    %12 = arith.divf %11, %10 : vector<1x128xf32>
    %c0_6 = arith.constant 0 : index
    %c0_7 = arith.constant 0 : index
    %13 = vector.load %arg3[%c0_6, %c0_7] : memref<1x128xf32, #tpu.memory_space<vmem>>, vector<1x128xf32>
    tpu.vector_store %arg3[%c0_6, %c0_7], %12 {strides = array<i32>} : memref<1x128xf32, #tpu.memory_space<vmem>>, vector<1x128xf32>,
    return
  }
  func.func @transform_0(%arg0: i32) -> (i32, i32) {
    %c0_i32 = arith.constant 0 : i32
    %c0_i32_0 = arith.constant 0 : i32
    %c0_i32_1 = arith.constant 0 : i32
    return %c0_i32, %c0_i32_0 : i32, i32
  }
  func.func @transform_1(%arg0: i32) -> (i32, i32) {
    %c0_i32 = arith.constant 0 : i32
    %c0_i32_0 = arith.constant 0 : i32
    return %c0_i32, %arg0 : i32, i32
  }
  func.func @transform_2(%arg0: i32) -> (i32, i32) {
    %c0_i32 = arith.constant 0 : i32
    %c0_i32_0 = arith.constant 0 : i32
    return %c0_i32, %arg0 : i32, i32
  }
}

</mosaic_0001>

<bundles_post_ra>
// kernel: tpu_custom_call.1
= control target key start
LH: loop header
LB: loop body
LE: loop exit
PB: predicated region body
PF: predicated region fallthrough
CT: control target
= control target key end

     0   :  { %7 = vsyncpa [#allocation3], 0  ;;  %s599_s0 = inlined_call_operand.vmem [shape: f32[8,1], index: 0, kind: input, shape index: {}]   ;;  %s600_s1 = inlined_call_operand.hbm [shape: f32[8,300], index: 1, kind: input, shape index: {}]   ;;  %s601_s2 = inlined_call_operand.hbm [shape: f32[1,300], index: 2, kind: output, shape index: {}]  }
   0x1   :  { %9 = vsyncpa [#allocation3 + $0x1], 0 }
   0x2   :  { %10 = vsyncpa [#allocation4], 0 }
   0x3   :  { %12 = vsyncpa [#allocation4 + $0x1], 0  ;;  %s436_s9 = smov 0   ;;  %s438_s10 = smov 0  }
   0x4   :  { %s440_s11 = smov 0   ;;  %s442_s12 = smov 0  }
   0x5 LB: > { %s457_s13 = sadd.s32 4294967295, %s416_s12   ;;  %s258_s14 = sadd.s32 4294967294, %s416_s12   ;;  %s416_s12 = sphi %s442_s12, %s615_s12   ;;  %s412_s11 = sphi %s440_s11, %s614_s11   ;;  %s408_s10 = sphi %s438_s10, %s613_s10   ;;  %s404_s9 = sphi %s436_s9, %s612_s9  }
   0x6   : > { %s461_s15 = sadd.s32 1, %s416_s12   ;;  %s46_s16 = sadd.s32 1, %s412_s11 }
   0x7   : > { %s43_s17 = ssub.s32 %s416_s12, %s461_s15  ;;  %p53_p0 = scmp.ne.s32.totalorder %s412_s11, %s408_s10 }
   0x8   : > { %p44_p1 = scmp.eq.s32.totalorder %s43_s17, 0  ;;  %p54_p2 = scmp.eq.s32.totalorder %s416_s12, 0 }
   0x9   : > { %p59_p3 = scmp.ne.s32.totalorder %s408_s10, %s404_s9  ;;  %p60_p4 = scmp.eq.s32.totalorder %s457_s13, 0 }
   0xa   : > { %s473_s18 = scalar_select %p44_p1, %s412_s11, %s46_s16  }
   0xb   : > { %p475_p5 = por %p54_p2, %p53_p0  ;;  %p479_p6 = por %p60_p4, %p59_p3 }
   0xc   : > { %p83_p7 = scmp.eq.s32.totalorder %s457_s13, 2  ;;  %p89_p8 = scmp.eq.s32.totalorder %s258_s14, 2 }
   0xd   : > { %p280_p9 = scmp.lt.s32.totalorder %s416_s12, 3  ;;  %s112_s23 = sand.u32 1, %s412_s11  }
   0xe   : > { %p485_p10 = por %p83_p7, %p53_p0  ;;  %p489_p11 = por %p89_p8, %p59_p3 }
   0xf   : > { %s262_s24 = sshll.u32 %s416_s12, 7  ;;  %s261_s25 = sshll.u32 %s112_s23, 3 }
  0x10   : > { %s605_s21 = scalar_select %p485_p10, 1, 0 }
  0x11   : > { %s606_s22 = scalar_select %p489_p11, 1, 0 }
  0x12   : > { %s498_s28 = scalar_lea.hbm %s600_s1, %s262_s24  ;;  %s116_s29 = scalar_lea.vmem [#allocation2], %s261_s25 }
  0x13   : > { %s123_s30 = sshll.u32 %s116_s29, 4  ;;  %p502_p12 = pnand %p280_p9, %p475_p5  ;;  %s506_s30 = int_to_ptr.vmem [resolvable:$true] %s123_s30 }
  0x14   : > { %s113_s4 = scalar_lea.sflag [#allocation3], %s112_s23  ;;  %s320_s5 = scalar_lea.hbm %s498_s28, 128 }
  0x15   : > { %p321_p1 = scmp.ne.s32.totalorder %s498_s28, %s320_s5  ;;  %p322_p2 = pneg %p502_p12 }
  0x16   : > { %s325_s8 = scalar_lea.hbm %s600_s1, 384  ;;  %p326_p5 = scmp.lt.u32.totalorder %s498_s28, %s600_s1 }
  0x17   : > { %p323_p3 = pnand %p322_p2, %p321_p1  ;;  %p327_p7 = scmp.lt.u32.totalorder %s325_s8, %s320_s5 }
  0x18   : > { %p329_p9 = scmp.lt.u32.totalorder %s320_s5, %s498_s28 }
  0x19   : > { %p324_p4 = pneg %p323_p3  ;;  %p328_p8 = por %p327_p7, %p326_p5 }
  0x1b   : > { %p330_p13 = por %p329_p9, %p328_p8 }
  0x1d   : > { %p331_p0 = pnand %p330_p13, %p324_p4 }
  0x1f   : > { %334 = shalt.err (!%p331_p0)
}
  0x20   : > { %s335_s17 = scalar_lea.vmem %s506_s30, 128  ;;  %s418_s19 = smov [#allocation2]  }
  0x21   : > { %p336_p1 = scmp.ne.s32.totalorder %s506_s30, %s335_s17  ;;  %s340_s23 = sshll.u32 %s418_s19, 4  ;;  %s341_s23 = int_to_ptr.vmem [resolvable:$false] %s340_s23 }
  0x22   : > { %s342_s24 = scalar_lea.vmem %s341_s23, 256  ;;  %p343_p10 = scmp.lt.s32.totalorder %s506_s30, %s341_s23 }
  0x23   : > { %p338_p3 = pnand %p336_p1, %p322_p2  ;;  %p344_p5 = scmp.lt.s32.totalorder %s342_s24, %s335_s17 }
  0x25   : > { %p339_p11 = pneg %p338_p3  ;;  %p345_p7 = por %p344_p5, %p343_p10 }
  0x27   : > { %p346_p8 = pnand %p345_p7, %p339_p11 }
  0x29   : > { %349 = shalt.err (!%p346_p8)
}
  0x2a   : > { %275 = dma.hbm_to_vmem [thread:$0]  (!%p502_p12), %s498_s28, 128, %s506_s30, %s113_s4  }
  0x2b   : > { %p608_p13 = scmp.lt.s32.totalorder %s416_s12, 4  ;;  %p609_p0 = scmp.ge.s32.totalorder %s416_s12, 1 }
  0x2d   : > { %p129_p2 = pnand %p609_p0, %p608_p13 }
  0x2e   : > { %s540_s25 = sand.u32 (!%p129_p2), 1, %s408_s10  }
  0x2f   : > { %132 = sbr.rel (%p129_p2) target bundleno = 241 (0xf1), region = 28  ;;  %s264_s26 = sshll.u32 (!%p129_p2), %s540_s25, 3 }
  0x30   : > { %s135_s27 = scalar_lea.sflag (!%p129_p2), [#allocation3], %s540_s25  ;;  %s138_s29 = scalar_lea.vmem (!%p129_p2), [#allocation2], %s264_s26 }
  0x36   : > { %395 = dma.done.wait (%p479_p6), %s135_s27, 128  }
  0x37   : > { %397 = vsyncadd (%p479_p6), %s135_s27, 4294967168  ;;  %v419_v0 = vmov 0   ;;  %v159_v1 = vld [vmem:[%s599_s0] sm:$0xff]  ;;  %s265_s20 = sshll.u32 %s457_s13, 4  ;;  %s157_s3 = scalar_lea.vmem [#allocation5], %s540_s25 }
  0x38   : > { %315 = vset.pattern.permute.xlu0 %v419_v0  ;;  %v158_v2 = vld [vmem:[%s138_s29] sm:$0xff]  ;;  %s192_s4 = sshll.u32 %s157_s3, 4  ;;  %s556_s7 = scalar_lea.hbm %s601_s2, %s265_s20  ;;  %s558_s4 = int_to_ptr.vmem [resolvable:$true] %s192_s4 }
  0x39   : > { %162 = vperm.xlu0 %315, %v159_v1   ;;  %s180_s8 = scalar_lea.sflag [#allocation4], %s540_s25  ;;  %s350_s14 = scalar_lea.vmem %s558_s4, 16 }
  0x3a   : > { %p351_p6 = scmp.ne.s32.totalorder %s558_s4, %s350_s14  ;;  %p610_p10 = scmp.ne.s32.totalorder %s605_s21, 0 }
  0x3b   : > { %s420_s13 = smov [#allocation5]  }
  0x3c   : > { %p352_p11 = pnand %p351_p6, %p610_p10  ;;  %s354_s16 = sshll.u32 %s420_s13, 4  ;;  %s355_s16 = int_to_ptr.vmem [resolvable:$false] %s354_s16 }
  0x3d   : > { %s356_s17 = scalar_lea.vmem %s355_s16, 32  ;;  %p357_p4 = scmp.lt.s32.totalorder %s558_s4, %s355_s16 }
  0x3e   : > { %p353_p12 = pneg %p352_p11  ;;  %p358_p9 = scmp.lt.s32.totalorder %s356_s17, %s350_s14 }
  0x40   : > { %p359_p1 = por %p358_p9, %p357_p4 }
  0x42   : > { %p360_p3 = pnand %p359_p1, %p353_p12 }
  0xb8   : > { %v163_v3 = vpop.permute.xlu0 %162 }
  0xb9   : > { %v165_v4 = vmul.f32 %v163_v3, %v158_v2 }
  0xbb   : > { %v166_v5 = vrot.slane %v165_v4, 4 }
  0xbd   : > { %v167_v6 = vadd.f32 %v166_v5, %v165_v4 }
  0xbf   : > { %v168_v7 = vrot.slane %v167_v6, 2 }
  0xc1   : > { %v169_v8 = vadd.f32 %v168_v7, %v167_v6 }
  0xc3   : > { %v170_v9 = vrot.slane %v169_v8, 1 }
  0xc5   : > { %v171_v10 = vadd.f32 %v170_v9, %v169_v8 }
  0xc7   : > { %v172_v11 = vsub.f32 0.0, %v171_v10 }
  0xc9   : > { %v173_v12 = vmul.f32 1.442695, %v172_v11 }
  0xcb   : > { %316 = vpow2.f32 %v173_v12 }
  0xd5   : > { %v317_v13 = vpop.eup %316 }
  0xd6   : > { %v175_v14 = vadd.f32 1.0, %v317_v13 }
  0xd8   : > { %318 = vrcp.f32 %v175_v14 }
  0xe2   : > { %v319_v15 = vpop.eup %318 }
  0xe3   : > { %178 = vst [vmem:[%s157_s3] sm:$0x1] %v319_v15 }
  0xe4   : > { %363 = shalt.err (!%p360_p3)
}
  0xe5   : > { %s364_s19 = scalar_lea.hbm %s556_s7, 16  ;;  %s368_s25 = scalar_lea.hbm %s601_s2, 48 }
  0xe6   : > { %p365_p5 = scmp.ne.s32.totalorder %s556_s7, %s364_s19  ;;  %p369_p13 = scmp.lt.u32.totalorder %s556_s7, %s601_s2 }
  0xe7   : > { %p370_p0 = scmp.lt.u32.totalorder %s368_s25, %s364_s19  ;;  %p372_p6 = scmp.lt.u32.totalorder %s364_s19, %s556_s7 }
  0xe8   : > { %p366_p7 = pnand %p365_p5, %p610_p10 }
  0xe9   : > { %p371_p2 = por %p370_p0, %p369_p13 }
  0xea   : > { %p367_p8 = pneg %p366_p7 }
  0xeb   : > { %p373_p11 = por %p372_p6, %p371_p2 }
  0xed   : > { %p374_p12 = pnand %p373_p11, %p367_p8 }
  0xef   : > { %377 = shalt.err (!%p374_p12)
}
  0xf0   : > { %270 = dma.vmem_to_hbm [thread:$0]  (%p610_p10), %s558_s4, 16, %s556_s7, %s180_s8  }
  0xf1 PF: > { %p281_p4 = scmp.ge.s32.totalorder %s416_s12, 2  ;;  %s204_s29 = sand.u32 1, %s404_s9  }
  0xf2   : > { %p611_p9 = scmp.ne.s32.totalorder %s606_s22, 0  ;;  %s205_s28 = scalar_lea.sflag [#allocation4], %s204_s29 }
  0xf4   : > { %p277_p1 = pnand %p281_p4, %p611_p9 }
  0xf6   : > { %399 = dma.done.wait (!%p277_p1), %s205_s28, 16  }
  0xf7   : > { %401 = vsyncadd (!%p277_p1), %s205_s28, 4294967280  ;;  %p15_p3 = scmp.ge.s32.totalorder %s461_s15, 5   ;;  %s612_s9 = smov %s408_s10 }
  0xf8   : > { %s613_s10 = smov %s412_s11  ;;  %s614_s11 = smov %s473_s18 }
  0xf9   : > { %s615_s12 = smov %s461_s15  ;;  %17 = sbr.rel (!%p15_p3) target bundleno = 5 (0x5), region = 73 }
 0x100   :  { %209 = vsyncpa [#allocation3], 1 }
 0x101   :  { %211 = vsyncpa [#allocation3 + $0x1], 1 }
 0x102   :  { %212 = vsyncpa [#allocation4], 1 }
 0x103   :  { %214 = vsyncpa [#allocation4 + $0x1], 1 }

</bundles_post_ra>
